<compile_context>
chip_gen: v6e
topology: v6e:2x2x1
jax: 0.10.0
libtpu: 0.0.40
codegen_flags: <defaults>
</compile_context>

<pallas_src>
import jax
import jax.numpy as jnp
from jax.experimental import pallas as pl
from jax.experimental.pallas import tpu as pltpu

INPUT_DIM = 16
OUTPUT_DIM = 6
PACK = 8                       # 128 // INPUT_DIM: original rows packed per lane-dense row
PACKED_IN = PACK * INPUT_DIM   # 128 input lanes
OUT_PAD = 8                    # per-row output slot (6 real + 2 zero) -> clean reshape
PACKED_OUT = PACK * OUT_PAD    # 64 output lanes per packed row
TILE_MAX = 512                 # packed rows per grid step (= 4096 original rows)


def _round_up(n, m):
    return ((n + m - 1) // m) * m


def _cdiv(a, b):
    return (a + b - 1) // b


def packed_linear_kernel(xp_ref, w_ref, b_ref, o_ref):
    # One MXU matmul per tile (K=128, lane-dense LHS) + VPU bias add.
    o_ref[...] = (
        jnp.dot(
            xp_ref[...],
            w_ref[...],
            preferred_element_type=jnp.float32,
            precision=jax.lax.Precision.HIGHEST,
        )
        + b_ref[...]
    ).astype(o_ref.dtype)


def pack_params(w_t, b):
    """Pack once at init: w_t [16, 6], b [6] -> (Wb [128, 64], bb [1, 64])."""
    w_block = jnp.zeros((PACKED_IN, PACKED_OUT), jnp.float32)
    b_block = jnp.zeros((1, PACKED_OUT), jnp.float32)
    for j in range(PACK):
        w_block = w_block.at[
            j * INPUT_DIM:(j + 1) * INPUT_DIM,
            j * OUT_PAD:j * OUT_PAD + OUTPUT_DIM,
        ].set(w_t)
        b_block = b_block.at[0, j * OUT_PAD:j * OUT_PAD + OUTPUT_DIM].set(
            b.reshape(-1)
        )
    return w_block, b_block


def _tiling(bp):
    """Choose (tile, padded_rows) for `bp` packed rows."""
    if bp <= 8:
        return bp, bp                      # single full-array block (legal: block == dim)
    bpp = _round_up(bp, 8)
    if bpp < 128:                          # < 1024 original rows: one step is cheapest
        return bpp, bpp
    g = max(2, _cdiv(bpp, TILE_MAX))       # >= 2 steps so v7x's 2 TCs both get work
    if g % 2:
        g += 1                             # even step count -> balanced across cores
    tile = _round_up(_cdiv(bpp, g), 8)
    return tile, tile * g


def qnetwork_forward(x, w_block, b_block):
    """x: [B, 16] f32; w_block/b_block from pack_params. Returns [B, 6] f32."""
    B = x.shape[0]

    # Pad batch only to a multiple of 8 (needed for the lane-dense reshape).
    b8 = _round_up(B, 8)
    if b8 != B:
        x = jnp.pad(x, ((0, b8 - B), (0, 0)))
    xp = x.reshape(b8 // PACK, PACKED_IN)          # [Bp, 128] lane-dense

    bp = xp.shape[0]
    tile, bpp = _tiling(bp)
    if bpp != bp:
        xp = jnp.pad(xp, ((0, bpp - bp), (0, 0)))  # only when actually needed

    grid = (bpp // tile,)

    out = pl.pallas_call(
        packed_linear_kernel,
        out_shape=jax.ShapeDtypeStruct((bpp, PACKED_OUT), jnp.float32),
        grid=grid,
        in_specs=[
            pl.BlockSpec((tile, PACKED_IN), lambda i: (i, 0)),
            pl.BlockSpec((PACKED_IN, PACKED_OUT), lambda i: (0, 0)),
            pl.BlockSpec((1, PACKED_OUT), lambda i: (0, 0)),
        ],
        out_specs=pl.BlockSpec((tile, PACKED_OUT), lambda i: (i, 0)),
        compiler_params=pltpu.CompilerParams(
            dimension_semantics=("parallel",),
        ),
    )(xp, w_block, b_block)

    # Undo the packing: [bpp, 64] -> [b8, 8] -> [B, 6].
    return out[:bp].reshape(b8, OUT_PAD)[:B, :OUTPUT_DIM]


# jit the wrapper so the (cheap) pad/reshape/slice plumbing fuses with the launch.
qnetwork_forward_jit = jax.jit(qnetwork_forward)


def init_params(key):
    """Deterministic init mirroring nn.Linear's default U(-1/sqrt(fan_in), +)."""
    kw, kb = jax.random.split(key)
    bound = 1.0 / jnp.sqrt(jnp.float32(INPUT_DIM))
    # PyTorch stores weight as [out, in]; we keep it transposed [in, out].
    w_t = jax.random.uniform(
        kw, (INPUT_DIM, OUTPUT_DIM), jnp.float32, minval=-bound, maxval=bound
    )
    b = jax.random.uniform(kb, (OUTPUT_DIM,), jnp.float32, minval=-bound, maxval=bound)
    return w_t, b


if __name__ == "__main__":
    key = jax.random.PRNGKey(0)
    k_in, k_params, k_big = jax.random.split(key, 3)

    w_t, b = init_params(k_params)
    w_block, b_block = pack_params(w_t, b)   # packed ONCE, reused per call

    # Small-batch case (matches the RL inference shape).
    batch = 2
    x = jax.random.normal(k_in, (batch, INPUT_DIM), dtype=jnp.float32)
    out = qnetwork_forward_jit(x, w_block, b_block)
    jax.block_until_ready(out)
    ref = x @ w_t + b
    assert out.shape == (batch, OUTPUT_DIM)
    assert jnp.allclose(out, ref, atol=1e-5, rtol=1e-5)

    # Larger batch exercises the multi-tile / both-TensorCore path.
    big_batch = 2048 + 40   # deliberately not a multiple of the tile size
    x_big = jax.random.normal(k_big, (big_batch, INPUT_DIM), dtype=jnp.float32)
    out_big = qnetwork_forward_jit(x_big, w_block, b_block)
    jax.block_until_ready(out_big)
    ref_big = x_big @ w_t + b
    assert out_big.shape == (big_batch, OUTPUT_DIM)
    assert jnp.allclose(out_big, ref_big, atol=1e-5, rtol=1e-5)

    print("KERNEL_OK")
</pallas_src>

<mosaic_0001>
module attributes {stable_mosaic.version = 11 : i64} {
  func.func @packed_linear_kernel(%arg0: i32, %arg1: memref<1x128xf32, #tpu.memory_space<vmem>>, %arg2: memref<128x64xf32, #tpu.memory_space<vmem>>, %arg3: memref<1x64xf32, #tpu.memory_space<vmem>>, %arg4: memref<1x64xf32, #tpu.memory_space<vmem>>) attributes {dimension_semantics = [#tpu.dimension_semantics<parallel>], iteration_bounds = array<i64: 1>, scalar_prefetch = 0 : i64, scratch_operands = 0 : i64, tpu.core_type = #tpu.core_type<tc>, window_params = [{transform_indices = @transform_0, window_bounds = array<i64: 1, 128>}, {pipeline_mode = #tpu.pipeline_mode<synchronous>, transform_indices = @transform_1, window_bounds = array<i64: 128, 64>}, {pipeline_mode = #tpu.pipeline_mode<synchronous>, transform_indices = @transform_2, window_bounds = array<i64: 1, 64>}, {transform_indices = @transform_3, window_bounds = array<i64: 1, 64>}]} {
    %c0 = arith.constant 0 : index
    %c0_0 = arith.constant 0 : index
    %0 = vector.load %arg1[%c0, %c0_0] : memref<1x128xf32, #tpu.memory_space<vmem>>, vector<1x128xf32>
    %c0_1 = arith.constant 0 : index
    %c0_2 = arith.constant 0 : index
    %1 = vector.load %arg2[%c0_1, %c0_2] : memref<128x64xf32, #tpu.memory_space<vmem>>, vector<128x64xf32>
    %cst = arith.constant dense<0.000000e+00> : vector<1x64xf32>
    %2 = tpu.matmul %0, %1, %cst {dimension_numbers = #tpu.dot_dimension_numbers<[1], [0], [0], [1], [0, 0, 1, 1], [], []>, precision = #tpu.contract_precision<fp32>} : vector<1x128xf32>, vector<128x64xf32>, vector<1x64xf32> -> vector<1x64xf32>
    %c0_3 = arith.constant 0 : index
    %c0_4 = arith.constant 0 : index
    %3 = vector.load %arg3[%c0_3, %c0_4] : memref<1x64xf32, #tpu.memory_space<vmem>>, vector<1x64xf32>
    %4 = arith.addf %2, %3 : vector<1x64xf32>
    %c0_5 = arith.constant 0 : index
    %c0_6 = arith.constant 0 : index
    %5 = vector.load %arg4[%c0_5, %c0_6] : memref<1x64xf32, #tpu.memory_space<vmem>>, vector<1x64xf32>
    tpu.vector_store %arg4[%c0_5, %c0_6], %4 {strides = array<i32>} : memref<1x64xf32, #tpu.memory_space<vmem>>, vector<1x64xf32>,
    return
  }
  func.func @transform_0(%arg0: i32) -> (i32, i32) {
    %c0_i32 = arith.constant 0 : i32
    %c0_i32_0 = arith.constant 0 : i32
    return %arg0, %c0_i32 : i32, i32
  }
  func.func @transform_1(%arg0: i32) -> (i32, i32) {
    %c0_i32 = arith.constant 0 : i32
    %c0_i32_0 = arith.constant 0 : i32
    %c0_i32_1 = arith.constant 0 : i32
    return %c0_i32, %c0_i32_0 : i32, i32
  }
  func.func @transform_2(%arg0: i32) -> (i32, i32) {
    %c0_i32 = arith.constant 0 : i32
    %c0_i32_0 = arith.constant 0 : i32
    %c0_i32_1 = arith.constant 0 : i32
    return %c0_i32, %c0_i32_0 : i32, i32
  }
  func.func @transform_3(%arg0: i32) -> (i32, i32) {
    %c0_i32 = arith.constant 0 : i32
    %c0_i32_0 = arith.constant 0 : i32
    return %arg0, %c0_i32 : i32, i32
  }
}

</mosaic_0001>

<bundles_post_ra>
// kernel: qnetwork_forward.1
= control target key start
LH: loop header
LB: loop body
LE: loop exit
PB: predicated region body
PF: predicated region fallthrough
CT: control target
= control target key end

     0   :  { %v993_v0 = vmov 0.0   ;;  %vm994_vm0 = vmmov 0   ;;  %vm673_vm1 = vcmask 516096   ;;  %s1435_s1 = inlined_call_operand.vmem [shape: f32[128,64], index: 1, kind: input, shape index: {}]   ;;  %s1436_s0 = inlined_call_operand.vmem [shape: f32[1,128], index: 0, kind: input, shape index: {}]   ;;  %s1437_s2 = inlined_call_operand.vmem [shape: f32[1,64], index: 2, kind: input, shape index: {}]   ;;  %s1438_s3 = inlined_call_operand.vmem [shape: f32[1,64], index: 3, kind: output, shape index: {}]  }
   0x1   :  { %781 = vmatprep.subr.mxu0 %v993_v0  ;;  %v30_v1 = vld [vmem:[%s1435_s1 + $0x78] sm:$0xff]  ;;  %v29_v2 = vld [vmem:[%s1435_s1 + $0x70] sm:$0xff]  ;;  %v28_v3 = vld [vmem:[%s1435_s1 + $0x68] sm:$0xff]  ;;  %816 = vmatprep.subr.mxu1 %v993_v0 }
   0x2   :  { %v1026_v4 = vand.u32 4294901760, %v30_v1  ;;  %v1028_v5 = vand.u32 4294901760, %v29_v2  ;;  %v1030_v6 = vand.u32 4294901760, %v28_v3  ;;  %v27_v7 = vld [vmem:[%s1435_s1 + $0x60] sm:$0xff]  ;;  %v26_v8 = vld [vmem:[%s1435_s1 + $0x58] sm:$0xff]  ;;  %v25_v9 = vld [vmem:[%s1435_s1 + $0x50] sm:$0xff]  ;;  %813 = vmatprep.mubr.msk.f32.mxu0 %vm994_vm0, %v993_v0  ;;  %848 = vmatprep.mubr.msk.f32.mxu1 %vm994_vm0, %v993_v0 }
   0x3   :  { %v1045_v10 = vand.u32 4294901760, %v27_v7  ;;  %v1047_v11 = vand.u32 4294901760, %v26_v8  ;;  %v1049_v12 = vand.u32 4294901760, %v25_v9  ;;  %v24_v13 = vld [vmem:[%s1435_s1 + $0x48] sm:$0xff]  ;;  %v23_v14 = vld [vmem:[%s1435_s1 + $0x40] sm:$0xff]  ;;  %v22_v19 = vld [vmem:[%s1435_s1 + $0x38] sm:$0xff] }
   0x4   :  { %782 = vmatpush3.msra.mxu0 %v1026_v4  ;;  %v1059_v15 = vsub.f32 %v30_v1, %v1026_v4  ;;  %v1062_v16 = vsub.f32 %v29_v2, %v1028_v5  ;;  %v1064_v17 = vand.u32 4294901760, %v24_v13  ;;  %v1067_v18 = vsub.f32 %v28_v3, %v1030_v6  ;;  %v21_v26 = vld [vmem:[%s1435_s1 + $0x30] sm:$0xff]  ;;  %v20_v36 = vld [vmem:[%s1435_s1 + $0x28] sm:$0xff]  ;;  %v19_v41 = vld [vmem:[%s1435_s1 + $0x20] sm:$0xff] }
   0x5   :  { %783 = vmatprep.subr.mxu0 %v993_v0  ;;  %v1074_v20 = vsub.f32 %v27_v7, %v1045_v10  ;;  %v1077_v21 = vsub.f32 %v26_v8, %v1047_v11  ;;  %v1083_v25 = vand.u32 4294901760, %v23_v14  ;;  %v1090_v28 = vand.u32 4294901760, %v22_v19  ;;  %v18_v49 = vld [vmem:[%s1435_s1 + $0x18] sm:$0xff]  ;;  %v14_v50 = vld [vmem:[%s1436_s0] sm:$0x1]  ;;  %v17_v54 = vld [vmem:[%s1435_s1 + $0x10] sm:$0xff] }
   0x6   :  { %784 = vmatpush3.msra.mxu0 %v1028_v5  ;;  %v126_v22 = vand.u32 4294901760, %v1059_v15  ;;  %v133_v23 = vand.u32 4294901760, %v1062_v16  ;;  %v140_v24 = vand.u32 4294901760, %v1067_v18  ;;  %v1094_v30 = vsub.f32 %v25_v9, %v1049_v12  ;;  %v16_v60 = vld [vmem:[%s1435_s1 + $0x8] sm:$0xff]  ;;  %v15_v7 = vld [vmem:[%s1435_s1] sm:$0xff] }
   0x7   :  { %785 = vmatprep.subr.mxu0 %v993_v0  ;;  %v147_v27 = vand.u32 4294901760, %v1074_v20  ;;  %v154_v29 = vand.u32 4294901760, %v1077_v21  ;;  %v1107_v34 = vsub.f32 %v24_v13, %v1064_v17  ;;  %v1110_v35 = vand.u32 4294901760, %v21_v26 }
   0x8   :  { %786 = vmatpush3.msra.mxu0 %v1030_v6  ;;  %v127_v31 = vsub.f32 %v1059_v15, %v126_v22  ;;  %v134_v32 = vsub.f32 %v1062_v16, %v133_v23  ;;  %v141_v33 = vsub.f32 %v1067_v18, %v140_v24  ;;  %v161_v40 = vand.u32 4294901760, %v1094_v30 }
   0x9   :  { %787 = vmatprep.subr.mxu0 %v993_v0  ;;  %v148_v39 = vsub.f32 %v1074_v20, %v147_v27  ;;  %v155_v42 = vsub.f32 %v1077_v21, %v154_v29  ;;  %v1128_v43 = vsub.f32 %v23_v14, %v1083_v25  ;;  %v1131_v45 = vand.u32 4294901760, %v20_v36 }
   0xa   :  { %788 = vmatpush3.msra.mxu0 %v1045_v10  ;;  %v128_v37 = vand.u32 4294901760, %v127_v31  ;;  %v135_v38 = vand.u32 4294901760, %v134_v32  ;;  %v142_v44 = vand.u32 4294901760, %v141_v33  ;;  %v168_v46 = vand.u32 4294901760, %v1107_v34 }
   0xb   :  { %789 = vmatprep.subr.mxu0 %v993_v0  ;;  %v1135_v47 = vsub.f32 %v22_v19, %v1090_v28  ;;  %v1139_v48 = vand.u32 4294901760, %v19_v41  ;;  %v149_v51 = vand.u32 4294901760, %v148_v39  ;;  %v162_v52 = vsub.f32 %v1094_v30, %v161_v40 }
   0xc   :  { %790 = vmatpush3.msra.mxu0 %v1047_v11  ;;  %817 = vmatpush3.msra.mxu1 %v128_v37  ;;  %v175_v53 = vand.u32 4294901760, %v1128_v43  ;;  %v1156_v55 = vsub.f32 %v21_v26, %v1110_v35  ;;  %v156_v56 = vand.u32 4294901760, %v155_v42  ;;  %v169_v58 = vsub.f32 %v1107_v34, %v168_v46 }
   0xd   :  { %791 = vmatprep.subr.mxu0 %v993_v0  ;;  %818 = vmatprep.subr.mxu1 %v993_v0  ;;  %v182_v57 = vand.u32 4294901760, %v1135_v47  ;;  %v1165_v59 = vand.u32 4294901760, %v18_v49  ;;  %v1171_v61 = vsub.f32 %v20_v36, %v1131_v45  ;;  %v1173_v62 = vand.u32 4294901760, %v14_v50 }
   0xe   :  { %792 = vmatpush3.msra.mxu0 %v1049_v12  ;;  %819 = vmatpush3.msra.mxu1 %v135_v38  ;;  %v1177_v63 = vand.u32 4294901760, %v17_v54  ;;  %v163_v1 = vand.u32 4294901760, %v162_v52  ;;  %v176_v2 = vsub.f32 %v1128_v43, %v175_v53  ;;  %v189_v3 = vand.u32 4294901760, %v1156_v55 }
   0xf   :  { %793 = vmatprep.subr.mxu0 %v993_v0  ;;  %820 = vmatprep.subr.mxu1 %v993_v0  ;;  %v1188_v8 = vsub.f32 %v19_v41, %v1139_v48  ;;  %v183_v9 = vsub.f32 %v1135_v47, %v182_v57  ;;  %v1195_v13 = vand.u32 4294901760, %v16_v60  ;;  %v170_v14 = vand.u32 4294901760, %v169_v58 }
  0x10   :  { %794 = vmatpush3.msra.mxu0 %v1064_v17  ;;  %821 = vmatpush3.msra.mxu1 %v142_v44  ;;  %v196_v19 = vand.u32 4294901760, %v1171_v61  ;;  %v1200_v26 = vsub.f32 %v14_v50, %v1173_v62  ;;  %v1203_v31 = vsub.f32 %v18_v49, %v1165_v59  ;;  %v1207_v32 = vand.u32 4294901760, %v15_v7 }
  0x11   :  { %795 = vmatprep.subr.mxu0 %v993_v0  ;;  %822 = vmatprep.subr.mxu1 %v993_v0  ;;  %v177_v33 = vand.u32 4294901760, %v176_v2  ;;  %v190_v36 = vsub.f32 %v1156_v55, %v189_v3  ;;  %v203_v37 = vand.u32 4294901760, %v1188_v8  ;;  %v1215_v38 = vsub.f32 %v17_v54, %v1177_v63 }
  0x12   :  { %796 = vmatpush3.msra.mxu0 %v1083_v25  ;;  %823 = vmatpush3.msra.mxu1 %v149_v51  ;;  %v184_v39 = vand.u32 4294901760, %v183_v9  ;;  %v197_v41 = vsub.f32 %v1171_v61, %v196_v19  ;;  %v115_v42 = vand.u32 4294901760, %v1200_v26  ;;  %v210_v44 = vand.u32 4294901760, %v1203_v31 }
  0x13   :  { %797 = vmatprep.subr.mxu0 %v993_v0  ;;  %824 = vmatprep.subr.mxu1 %v993_v0  ;;  %v1226_v49 = vsub.f32 %v16_v60, %v1195_v13  ;;  %v191_v50 = vand.u32 4294901760, %v190_v36  ;;  %v204_v51 = vsub.f32 %v1188_v8, %v203_v37  ;;  %v217_v52 = vand.u32 4294901760, %v1215_v38 }
  0x14   :  { %798 = vmatpush3.msra.mxu0 %v1090_v28  ;;  %825 = vmatpush3.msra.mxu1 %v156_v56  ;;  %v1236_v54 = vsub.f32 %v15_v7, %v1207_v32  ;;  %v198_v56 = vand.u32 4294901760, %v197_v41  ;;  %v116_v58 = vsub.f32 %v1200_v26, %v115_v42  ;;  %v211_v60 = vsub.f32 %v1203_v31, %v210_v44 }
  0x15   :  { %799 = vmatprep.subr.mxu0 %v993_v0  ;;  %826 = vmatprep.subr.mxu1 %v993_v0  ;;  %v205_v2 = vand.u32 4294901760, %v204_v51  ;;  %v218_v7 = vsub.f32 %v1215_v38, %v217_v52 }
  0x16   :  { %800 = vmatpush3.msra.mxu0 %v1110_v35  ;;  %827 = vmatpush3.msra.mxu1 %v163_v1  ;;  %v224_v1 = vand.u32 4294901760, %v1226_v49  ;;  %v231_v9 = vand.u32 4294901760, %v1236_v54 }
  0x17   :  { %801 = vmatprep.subr.mxu0 %v993_v0  ;;  %828 = vmatprep.subr.mxu1 %v993_v0 }
  0x18   :  { %802 = vmatpush3.msra.mxu0 %v1131_v45  ;;  %829 = vmatpush3.msra.mxu1 %v170_v14  ;;  %v117_v14 = vand.u32 4294901760, %v116_v58  ;;  %v225_v36 = vsub.f32 %v1226_v49, %v224_v1  ;;  %v232_v41 = vsub.f32 %v1236_v54, %v231_v9 }
  0x19   :  { %803 = vmatprep.subr.mxu0 %v993_v0  ;;  %830 = vmatprep.subr.mxu1 %v993_v0 }
  0x1a   :  { %804 = vmatpush3.msra.mxu0 %v1139_v48  ;;  %831 = vmatpush3.msra.mxu1 %v177_v33  ;;  %v212_v33 = vand.u32 4294901760, %v211_v60  ;;  %v233_v51 = vand.u32 4294901760, %v232_v41 }
  0x1b   :  { %805 = vmatprep.subr.mxu0 %v993_v0  ;;  %832 = vmatprep.subr.mxu1 %v993_v0 }
  0x1c   :  { %806 = vmatpush3.msra.mxu0 %v1165_v59  ;;  %833 = vmatpush3.msra.mxu1 %v184_v39  ;;  %v219_v39 = vand.u32 4294901760, %v218_v7 }
  0x1d   :  { %807 = vmatprep.subr.mxu0 %v993_v0  ;;  %834 = vmatprep.subr.mxu1 %v993_v0 }
  0x1e   :  { %808 = vmatpush3.msra.mxu0 %v1177_v63  ;;  %835 = vmatpush3.msra.mxu1 %v191_v50  ;;  %v226_v50 = vand.u32 4294901760, %v225_v36 }
  0x1f   :  { %809 = vmatprep.subr.mxu0 %v993_v0  ;;  %836 = vmatprep.subr.mxu1 %v993_v0 }
  0x20   :  { %810 = vmatpush3.msra.mxu0 %v1195_v13  ;;  %837 = vmatpush3.msra.mxu1 %v198_v56 }
  0x21   :  { %811 = vmatprep.subr.mxu0 %v993_v0  ;;  %838 = vmatprep.subr.mxu1 %v993_v0 }
  0x22   :  { %812 = vmatpush3.msra.mxu0 %v1207_v32  ;;  %839 = vmatpush3.msra.mxu1 %v205_v2 }
  0x23   :  { %840 = vmatprep.subr.mxu1 %v993_v0  ;;  %851 = vmatprep.subr.mxu0 %v993_v0 }
  0x24   :  { %814 = vmatmul.mubr.f32.vlgmr.msra.gmra.mxu0 %v117_v14  ;;  %841 = vmatpush3.msra.mxu1 %v212_v33 }
  0x25   :  { %852 = vmatpush3.msra.mxu0 %v1059_v15  ;;  %842 = vmatprep.subr.mxu1 %v993_v0 }
  0x26   :  { %853 = vmatprep.subr.mxu0 %v993_v0  ;;  %843 = vmatpush3.msra.mxu1 %v219_v39 }
  0x27   :  { %854 = vmatpush3.msra.mxu0 %v1062_v16  ;;  %844 = vmatprep.subr.mxu1 %v993_v0 }
  0x28   :  { %855 = vmatprep.subr.mxu0 %v993_v0  ;;  %845 = vmatpush3.msra.mxu1 %v226_v50 }
  0x29   :  { %856 = vmatpush3.msra.mxu0 %v1067_v18  ;;  %846 = vmatprep.subr.mxu1 %v993_v0 }
  0x2a   :  { %857 = vmatprep.subr.mxu0 %v993_v0  ;;  %847 = vmatpush3.msra.mxu1 %v233_v51 }
  0x2b   :  { %858 = vmatpush3.msra.mxu0 %v1074_v20  ;;  %849 = vmatmul.mubr.f32.vlgmr.msra.gmra.mxu1 %v1173_v62 }
  0x2c   :  { %859 = vmatprep.subr.mxu0 %v993_v0  ;;  %886 = vmatprep.subr.mxu1 %v993_v0 }
  0x2d   :  { %860 = vmatpush3.msra.mxu0 %v1077_v21  ;;  %887 = vmatpush3.msra.mxu1 %v1026_v4 }
  0x2e   :  { %861 = vmatprep.subr.mxu0 %v993_v0  ;;  %888 = vmatprep.subr.mxu1 %v993_v0 }
  0x2f   :  { %862 = vmatpush3.msra.mxu0 %v1094_v30  ;;  %889 = vmatpush3.msra.mxu1 %v1028_v5 }
  0x30   :  { %863 = vmatprep.subr.mxu0 %v993_v0  ;;  %890 = vmatprep.subr.mxu1 %v993_v0 }
  0x31   :  { %864 = vmatpush3.msra.mxu0 %v1107_v34  ;;  %891 = vmatpush3.msra.mxu1 %v1030_v6 }
  0x32   :  { %865 = vmatprep.subr.mxu0 %v993_v0  ;;  %892 = vmatprep.subr.mxu1 %v993_v0 }
  0x33   :  { %866 = vmatpush3.msra.mxu0 %v1128_v43  ;;  %893 = vmatpush3.msra.mxu1 %v1045_v10 }
  0x34   :  { %867 = vmatprep.subr.mxu0 %v993_v0  ;;  %894 = vmatprep.subr.mxu1 %v993_v0 }
  0x35   :  { %868 = vmatpush3.msra.mxu0 %v1135_v47  ;;  %895 = vmatpush3.msra.mxu1 %v1047_v11 }
  0x36   :  { %869 = vmatprep.subr.mxu0 %v993_v0  ;;  %896 = vmatprep.subr.mxu1 %v993_v0 }
  0x37   :  { %870 = vmatpush3.msra.mxu0 %v1156_v55  ;;  %897 = vmatpush3.msra.mxu1 %v1049_v12 }
  0x38   :  { %871 = vmatprep.subr.mxu0 %v993_v0  ;;  %898 = vmatprep.subr.mxu1 %v993_v0 }
  0x39   :  { %872 = vmatpush3.msra.mxu0 %v1171_v61  ;;  %899 = vmatpush3.msra.mxu1 %v1064_v17 }
  0x3a   :  { %873 = vmatprep.subr.mxu0 %v993_v0  ;;  %900 = vmatprep.subr.mxu1 %v993_v0 }
  0x3b   :  { %874 = vmatpush3.msra.mxu0 %v1188_v8  ;;  %901 = vmatpush3.msra.mxu1 %v1083_v25 }
  0x3c   :  { %875 = vmatprep.subr.mxu0 %v993_v0  ;;  %902 = vmatprep.subr.mxu1 %v993_v0 }
  0x3d   :  { %876 = vmatpush3.msra.mxu0 %v1203_v31  ;;  %903 = vmatpush3.msra.mxu1 %v1090_v28 }
  0x3e   :  { %877 = vmatprep.subr.mxu0 %v993_v0  ;;  %904 = vmatprep.subr.mxu1 %v993_v0 }
  0x3f   :  { %878 = vmatpush3.msra.mxu0 %v1215_v38  ;;  %905 = vmatpush3.msra.mxu1 %v1110_v35 }
  0x40   :  { %879 = vmatprep.subr.mxu0 %v993_v0  ;;  %906 = vmatprep.subr.mxu1 %v993_v0 }
  0x41   :  { %880 = vmatpush3.msra.mxu0 %v1226_v49  ;;  %907 = vmatpush3.msra.mxu1 %v1131_v45 }
  0x42   :  { %881 = vmatprep.subr.mxu0 %v993_v0  ;;  %908 = vmatprep.subr.mxu1 %v993_v0 }
  0x43   :  { %882 = vmatpush3.msra.mxu0 %v1236_v54  ;;  %883 = vmatprep.mubr.msk.f32.mxu0 %vm994_vm0, %v993_v0 }
  0x44   :  { %909 = vmatpush3.msra.mxu1 %v1139_v48  ;;  %884 = vmatmul.mubr.f32.vlgmr.msra.gmra.mxu0 %v1200_v26 }
  0x45   :  { %910 = vmatprep.subr.mxu1 %v993_v0  ;;  %921 = vmatprep.subr.mxu0 %v993_v0 }
  0x46   :  { %911 = vmatpush3.msra.mxu1 %v1165_v59  ;;  %922 = vmatpush3.msra.mxu0 %v126_v22 }
  0x47   :  { %912 = vmatprep.subr.mxu1 %v993_v0  ;;  %923 = vmatprep.subr.mxu0 %v993_v0 }
  0x48   :  { %913 = vmatpush3.msra.mxu1 %v1177_v63  ;;  %924 = vmatpush3.msra.mxu0 %v133_v23 }
  0x49   :  { %914 = vmatprep.subr.mxu1 %v993_v0  ;;  %925 = vmatprep.subr.mxu0 %v993_v0 }
  0x4a   :  { %915 = vmatpush3.msra.mxu1 %v1195_v13  ;;  %926 = vmatpush3.msra.mxu0 %v140_v24 }
  0x4b   :  { %916 = vmatprep.subr.mxu1 %v993_v0  ;;  %927 = vmatprep.subr.mxu0 %v993_v0 }
  0x4c   :  { %917 = vmatpush3.msra.mxu1 %v1207_v32  ;;  %918 = vmatprep.mubr.msk.f32.mxu1 %vm994_vm0, %v993_v0 }
  0x4d   :  { %928 = vmatpush3.msra.mxu0 %v147_v27  ;;  %919 = vmatmul.mubr.f32.vlgmr.msra.gmra.mxu1 %v115_v42 }
  0x4e   :  { %929 = vmatprep.subr.mxu0 %v993_v0  ;;  %956 = vmatprep.subr.mxu1 %v993_v0 }
  0x4f   :  { %930 = vmatpush3.msra.mxu0 %v154_v29  ;;  %957 = vmatpush3.msra.mxu1 %v1026_v4 }
  0x50   :  { %931 = vmatprep.subr.mxu0 %v993_v0  ;;  %958 = vmatprep.subr.mxu1 %v993_v0 }
  0x51   :  { %932 = vmatpush3.msra.mxu0 %v161_v40  ;;  %959 = vmatpush3.msra.mxu1 %v1028_v5 }
  0x52   :  { %933 = vmatprep.subr.mxu0 %v993_v0  ;;  %960 = vmatprep.subr.mxu1 %v993_v0 }
  0x53   :  { %934 = vmatpush3.msra.mxu0 %v168_v46  ;;  %961 = vmatpush3.msra.mxu1 %v1030_v6 }
  0x54   :  { %935 = vmatprep.subr.mxu0 %v993_v0  ;;  %962 = vmatprep.subr.mxu1 %v993_v0 }
  0x55   :  { %936 = vmatpush3.msra.mxu0 %v175_v53  ;;  %963 = vmatpush3.msra.mxu1 %v1045_v10 }
  0x56   :  { %937 = vmatprep.subr.mxu0 %v993_v0  ;;  %964 = vmatprep.subr.mxu1 %v993_v0 }
  0x57   :  { %938 = vmatpush3.msra.mxu0 %v182_v57  ;;  %965 = vmatpush3.msra.mxu1 %v1047_v11 }
  0x58   :  { %939 = vmatprep.subr.mxu0 %v993_v0  ;;  %966 = vmatprep.subr.mxu1 %v993_v0 }
  0x59   :  { %940 = vmatpush3.msra.mxu0 %v189_v3  ;;  %967 = vmatpush3.msra.mxu1 %v1049_v12 }
  0x5a   :  { %941 = vmatprep.subr.mxu0 %v993_v0  ;;  %968 = vmatprep.subr.mxu1 %v993_v0 }
  0x5b   :  { %942 = vmatpush3.msra.mxu0 %v196_v19  ;;  %969 = vmatpush3.msra.mxu1 %v1064_v17  ;;  %v31_v17 = vld [vmem:[%s1437_s2] sm:$0x1] }
  0x5c   :  { %943 = vmatprep.subr.mxu0 %v993_v0  ;;  %970 = vmatprep.subr.mxu1 %v993_v0 }
  0x5d   :  { %944 = vmatpush3.msra.mxu0 %v203_v37  ;;  %971 = vmatpush3.msra.mxu1 %v1083_v25 }
  0x5e   :  { %945 = vmatprep.subr.mxu0 %v993_v0  ;;  %972 = vmatprep.subr.mxu1 %v993_v0 }
  0x5f   :  { %946 = vmatpush3.msra.mxu0 %v210_v44  ;;  %973 = vmatpush3.msra.mxu1 %v1090_v28 }
  0x60   :  { %947 = vmatprep.subr.mxu0 %v993_v0  ;;  %974 = vmatprep.subr.mxu1 %v993_v0 }
  0x61   :  { %948 = vmatpush3.msra.mxu0 %v217_v52  ;;  %975 = vmatpush3.msra.mxu1 %v1110_v35 }
  0x62   :  { %949 = vmatprep.subr.mxu0 %v993_v0  ;;  %976 = vmatprep.subr.mxu1 %v993_v0 }
  0x63   :  { %950 = vmatpush3.msra.mxu0 %v224_v1  ;;  %977 = vmatpush3.msra.mxu1 %v1131_v45 }
  0x64   :  { %951 = vmatprep.subr.mxu0 %v993_v0  ;;  %978 = vmatprep.subr.mxu1 %v993_v0 }
  0x65   :  { %952 = vmatpush3.msra.mxu0 %v231_v9  ;;  %953 = vmatprep.mubr.msk.f32.mxu0 %vm994_vm0, %v993_v0 }
  0x66   :  { %979 = vmatpush3.msra.mxu1 %v1139_v48  ;;  %954 = vmatmul.mubr.f32.vlgmr.msra.gmra.mxu0 %v1173_v62 }
  0x67   :  { %980 = vmatprep.subr.mxu1 %v993_v0  ;;  %988 = vmatprep.mubr.msk.f32.mxu1 %vm994_vm0, %v993_v0 }
  0x68   :  { %981 = vmatpush3.msra.mxu1 %v1165_v59 }
  0x69   :  { %982 = vmatprep.subr.mxu1 %v993_v0 }
  0x6a   :  { %983 = vmatpush3.msra.mxu1 %v1177_v63 }
  0x6b   :  { %984 = vmatprep.subr.mxu1 %v993_v0 }
  0x6c   :  { %985 = vmatpush3.msra.mxu1 %v1195_v13 }
  0x6d   :  { %986 = vmatprep.subr.mxu1 %v993_v0 }
  0x6e   :  { %987 = vmatpush3.msra.mxu1 %v1207_v32 }
  0x6f   :  { %989 = vmatmul.mubr.f32.vlgmr.msra.gmra.mxu1 %v1173_v62 }
  0xe4   :  { %v119_v4 = vpop.f32.mrf.mxu0 }
  0xe5   :  { %v120_v18 = vadd.f32 %v119_v4, %v31_v17 }
  0xe6   :  { %v815_v5 = vpop.f32.mrf.mxu0 }
  0xeb   :  { %v270_v6 = vpop.f32.mrf.mxu1 }
  0xec   :  { %v271_v21 = vadd.f32 %v270_v6, %v120_v18 }
  0xed   :  { %v850_v10 = vpop.f32.mrf.mxu1 }
 0x104   :  { %v374_v11 = vpop.f32.mrf.mxu0 }
 0x105   :  { %v375_v22 = vadd.f32 %v374_v11, %v271_v21 }
 0x106   :  { %v885_v12 = vpop.f32.mrf.mxu0 }
 0x10d   :  { %v463_v15 = vpop.f32.mrf.mxu1 }
 0x10e   :  { %v464_v23 = vadd.f32 %v463_v15, %v375_v22 }
 0x10f   :  { %v920_v16 = vpop.f32.mrf.mxu1 }
 0x126   :  { %v582_v20 = vpop.f32.mrf.mxu0 }
 0x127   :  { %v583_v24 = vadd.f32 %v582_v20, %v464_v23 }
 0x128   :  { %v955_v0 = vpop.f32.mrf.mxu0 }
 0x12f   :  { %v669_v25 = vpop.f32.mrf.mxu1 }
 0x130   :  { %v670_v27 = vadd.f32 %v669_v25, %v583_v24 }
 0x131   :  { %v990_v28 = vpop.f32.mrf.mxu1 }
 0x132   :  { %674 = vst.msk [vmem:[%s1438_s3] sm:$0x1] %vm673_vm1, %v670_v27 }

</bundles_post_ra>
